<compile_context>
chip_gen: v5e
topology: v5e:2x2
jax: 0.10.0
libtpu: 0.0.40
codegen_flags: <defaults>
</compile_context>

<pallas_src>
import math
from functools import partial

import jax
import jax.numpy as jnp
import numpy as np
from jax.experimental import pallas as pl
from jax.experimental.pallas import tpu as pltpu

# ----------------------- config (small, consistent with module) -------------
INPUT_SIZE = 8 * 8          # small 8x8 "MNIST-like" images
DIM = 16
N_LAYERS = 1                # hard-coded single Mamba layer
D_STATE = 8
D_CONV = 5
EXPAND = 2
D_INNER = EXPAND * DIM      # 32
DT_RANK = math.ceil(DIM / 16)   # 1
NUM_CLASSES = 10
SEQ_LEN = 1                 # MambaMNIST: unsqueeze(1) -> seq_len == 1
EPS = 1e-6
BATCH = 2
OUT_PAD = 128               # lane-dense kernel output width (sliced to 10 outside)

# batch tiling knobs
_ALIGN = 16                 # bf16 sublane packing -> keep tiles 16-row aligned
_MAX_TILE = 2048            # amortizes per-grid-step overhead, fits VMEM everywhere
_SPLIT_THRESH = 512         # above this, keep >=2 tiles so v7x megacore is used

# ------------------ packed parameter slab layout -----------------------------
# One (88, 128) f32 slab (44 KiB), resident in VMEM across all batch tiles.
# Matrices are lane-packed side by side; row starts are 8-aligned.
#   (row, col, n_rows, n_cols)
TOTAL_ROWS = 88
_W_IN = (0, 0, INPUT_SIZE, DIM)            # (64, 16)
_W_OUT = (0, 16, D_INNER, DIM)             # (32, 16)
_W_XZ = (0, 64, DIM, 2 * D_INNER)          # (16, 64)  norm_w + conv tap folded
_W_DTM = (16, 64, D_INNER, 2 * D_INNER)    # (32, 64)  [dt_proj-folded | W_B @ W_C^T]
_W_HEAD = (64, 0, DIM, OUT_PAD)            # (16, 128) normf_w folded, zero-padded
_R_V0 = 80   # [b_x'(0:32) | b_z(32:64) | b_dt(64:96) | D(96:128)]
_R_V1 = 81   # [b_in(0:16) | b_out(16:32)]
_R_V2 = 82   # b_head (0:128), zero-padded


# ------------------------------- kernel -------------------------------------
def mamba_mnist_kernel(x_ref, p_ref, logits_ref):
    """x_ref: (TB, INPUT_SIZE) bf16; p_ref: (88, 128) f32; logits_ref: (TB, 128) bf16."""
    f32 = jnp.float32

    def mat(spec):
        r, c, nr, nc = spec
        return p_ref[r:r + nr, c:c + nc]

    def vec(row, c0, c1):
        return p_ref[row:row + 1, c0:c1]

    def silu(v):
        return v * jax.nn.sigmoid(v)

    def rms_scale(v):
        # rmsnorm WITHOUT its weight (weights folded into the next matmul);
        # single rsqrt (EUP) instead of sqrt + divide.
        return v * jax.lax.rsqrt(jnp.mean(v * v, axis=-1, keepdims=True) + EPS)

    x = x_ref[...].astype(f32)                                         # (TB, 64)

    # ---- input_proj (the single token of the length-1 sequence) ------------
    h = jnp.dot(x, mat(_W_IN), preferred_element_type=f32) + vec(_R_V1, 0, DIM)

    # ------------------------ Mamba block (n_layers = 1) --------------------
    hn = rms_scale(h)                      # norm.weight folded into _W_XZ rows

    # fused in_proj (x | z); conv last-tap/bias pre-folded into the x columns
    xz = jnp.dot(hn, mat(_W_XZ), preferred_element_type=f32)          # (TB, 64)
    x_conv = silu(xz[:, 0:D_INNER] + vec(_R_V0, 0, 32))
    z = xz[:, D_INNER:2 * D_INNER] + vec(_R_V0, 32, 64)

    # fused x_proj: [dt | m]  with dt_proj folded in and m = x_conv @ (W_B W_C^T)
    dtm = jnp.dot(x_conv, mat(_W_DTM), preferred_element_type=f32)    # (TB, 64)
    dt = jax.nn.softplus(dtm[:, 0:D_INNER] + vec(_R_V0, 64, 96))
    bc = jnp.sum(dtm[:, D_INNER:2 * D_INNER] * x_conv, axis=-1, keepdims=True)

    # selective SSM at seq_len == 1 with zero initial state:
    #   y = x_conv*dt*<B_t,C_t> + D*x_conv = x_conv*(dt*bc + D); gate by silu(z)
    y = x_conv * (dt * bc + vec(_R_V0, 96, 128)) * silu(z)

    out = jnp.dot(y, mat(_W_OUT), preferred_element_type=f32) + vec(_R_V1, 16, 32)
    h = h + out                                                       # residual

    # ---------------- final norm (weight folded into head) + head -----------
    hf = rms_scale(h)
    logits = (jnp.dot(hf, mat(_W_HEAD), preferred_element_type=f32)
              + vec(_R_V2, 0, OUT_PAD))
    logits_ref[...] = logits.astype(logits_ref.dtype)                 # bf16 store


# ------------------------------- wrapper -------------------------------------
def _round_up(n, m):
    return ((n + m - 1) // m) * m


def _choose_tiling(b):
    """Pick (padded batch, batch tile) once; tb always divides b_pad.

    - pad only to a multiple of 16 rows (no over-padding of ragged batches)
    - tiles capped at 2048 rows (overhead amortized, VMEM-safe on v5e/v6e/v7x)
    - >=2 tiles when there is enough work so v7x's two TensorCores both run.
    """
    ba = _round_up(max(b, 1), _ALIGN)
    n = max(1, -(-ba // _MAX_TILE))
    if ba >= _SPLIT_THRESH:
        n = max(n, 2)
    tb = _round_up(-(-ba // n), _ALIGN)
    return tb * n, tb


@partial(jax.jit, static_argnums=(2,))
def _forward_padded(x_flat_pad, packed, tb):
    b_pad = x_flat_pad.shape[0]
    grid = (b_pad // tb,)
    return pl.pallas_call(
        mamba_mnist_kernel,
        out_shape=jax.ShapeDtypeStruct((b_pad, OUT_PAD), jnp.bfloat16),
        grid_spec=pltpu.PrefetchScalarGridSpec(
            num_scalar_prefetch=0,
            grid=grid,
            in_specs=[
                pl.BlockSpec((tb, INPUT_SIZE), lambda i: (i, 0)),
                # constant index_map -> the packed weight slab stays resident
                # in VMEM across all batch tiles
                pl.BlockSpec((TOTAL_ROWS, 128), lambda i: (0, 0)),
            ],
            out_specs=pl.BlockSpec((tb, OUT_PAD), lambda i: (i, 0)),
        ),
        compiler_params=pltpu.CompilerParams(
            dimension_semantics=("parallel",)),
    )(x_flat_pad, packed)


def mamba_mnist_forward(x_img, packed):
    b = x_img.shape[0]
    # bf16 input: halves the per-row HBM read; kernel upcasts to f32 at once
    x_flat = x_img.reshape(b, -1).astype(jnp.bfloat16)
    b_pad, tb = _choose_tiling(b)
    if b_pad != b:
        x_flat = jnp.pad(x_flat, ((0, b_pad - b), (0, 0)))
    logits_pad = _forward_padded(x_flat, packed, tb)
    return logits_pad[:b, :NUM_CLASSES].astype(jnp.float32)


# --------------------------- deterministic params ----------------------------
def make_params(key):
    ks = jax.random.split(key, 13)

    def uni(k, shape, fan_in):
        bound = 1.0 / math.sqrt(fan_in)
        return jax.random.uniform(k, shape, jnp.float32, -bound, bound)

    p = {}
    p["w_in"] = uni(ks[0], (INPUT_SIZE, DIM), INPUT_SIZE)
    p["b_in"] = uni(ks[1], (1, DIM), INPUT_SIZE)
    p["norm_w"] = jnp.ones((1, DIM), jnp.float32)
    p["w_inproj"] = uni(ks[2], (DIM, 2 * D_INNER), DIM)
    p["b_inproj"] = uni(ks[3], (1, 2 * D_INNER), DIM)
    p["conv_w"] = uni(ks[4], (D_CONV, D_INNER), D_CONV)      # depthwise taps
    p["conv_b"] = uni(ks[5], (1, D_INNER), D_CONV)
    p["w_xproj"] = uni(ks[6], (D_INNER, DT_RANK + 2 * D_STATE), D_INNER)
    dt_init_std = DT_RANK ** -0.5
    p["w_dt"] = jax.random.uniform(ks[7], (DT_RANK, D_INNER), jnp.float32,
                                   -dt_init_std, dt_init_std)
    dt_min, dt_max, dt_floor = 0.001, 0.1, 1e-4
    dt = jnp.exp(jax.random.uniform(ks[8], (D_INNER,), jnp.float32)
                 * (math.log(dt_max) - math.log(dt_min)) + math.log(dt_min))
    dt = jnp.maximum(dt, dt_floor)
    p["b_dt"] = jnp.log(jnp.exp(dt) - 1.0).reshape(1, D_INNER)
    p["A_log"] = jnp.broadcast_to(
        jnp.log(jnp.arange(1, D_STATE + 1, dtype=jnp.float32)),
        (D_INNER, D_STATE)).copy()       # used only by the reference (drops out at seq_len==1)
    p["D"] = jnp.ones((1, D_INNER), jnp.float32)
    p["w_out"] = uni(ks[9], (D_INNER, DIM), D_INNER)
    p["b_out"] = uni(ks[10], (1, DIM), D_INNER)
    p["normf_w"] = jnp.ones((1, DIM), jnp.float32)
    p["w_head"] = uni(ks[11], (DIM, NUM_CLASSES), DIM)
    p["b_head"] = uni(ks[12], (1, NUM_CLASSES), DIM)
    return p


def pack_params(p):
    """Fold + lane-pack every parameter into one (88, 128) f32 slab."""
    assert SEQ_LEN == 1, "kernel hard-codes seq_len==1 / zero initial SSM state"
    P = np.zeros((TOTAL_ROWS, 128), np.float32)

    def put(r, c, a):
        a = np.asarray(a, np.float32)
        P[r:r + a.shape[0], c:c + a.shape[1]] = a

    norm_w = np.asarray(p["norm_w"], np.float32).reshape(-1)          # (16,)
    normf_w = np.asarray(p["normf_w"], np.float32).reshape(-1)        # (16,)
    tap = np.asarray(p["conv_w"], np.float32)[D_CONV - 1]             # (32,) last causal tap
    w_x = np.asarray(p["w_inproj"], np.float32)[:, :D_INNER]
    w_z = np.asarray(p["w_inproj"], np.float32)[:, D_INNER:]
    b_x = np.asarray(p["b_inproj"], np.float32)[:, :D_INNER]
    b_z = np.asarray(p["b_inproj"], np.float32)[:, D_INNER:]
    w_xp = np.asarray(p["w_xproj"], np.float32)

    # dt_proj folded through x_proj's dt columns: (Di,R)@(R,Di) -> (Di,Di)
    w_dtfold = w_xp[:, :DT_RANK] @ np.asarray(p["w_dt"], np.float32)
    # W_B @ W_C^T fold: bc = <B_t,C_t> = sum((x_conv @ M) * x_conv)
    M = (w_xp[:, DT_RANK:DT_RANK + D_STATE]
         @ w_xp[:, DT_RANK + D_STATE:].T)                             # (32, 32)

    # matrices (norm.weight scales the rows, conv tap scales the x columns)
    put(_W_IN[0], _W_IN[1], p["w_in"])
    put(_W_OUT[0], _W_OUT[1], p["w_out"])
    w_xz = np.concatenate([norm_w[:, None] * w_x * tap[None, :],
                           norm_w[:, None] * w_z], axis=1)            # (16, 64)
    put(_W_XZ[0], _W_XZ[1], w_xz)
    put(_W_DTM[0], _W_DTM[1], np.concatenate([w_dtfold, M], axis=1))  # (32, 64)
    put(_W_HEAD[0], _W_HEAD[1],
        normf_w[:, None] * np.asarray(p["w_head"], np.float32))       # zero-padded to 128

    # vector rows
    put(_R_V0, 0, b_x * tap[None, :] + np.asarray(p["conv_b"], np.float32))  # b_x' (conv fold)
    put(_R_V0, 32, b_z)
    put(_R_V0, 64, p["b_dt"])
    put(_R_V0, 96, p["D"])
    put(_R_V1, 0, p["b_in"])
    put(_R_V1, 16, p["b_out"])
    put(_R_V2, 0, p["b_head"])                                        # zero-padded to 128
    return jnp.asarray(P)


# ------------------------------ pure-JAX reference ---------------------------
def reference_forward(x_img, p):
    """Faithful (unfolded, f32) math of the original PyTorch module at seq_len==1."""
    b = x_img.shape[0]
    x = x_img.reshape(b, -1).astype(jnp.float32)
    h = x @ p["w_in"] + p["b_in"]

    def rmsnorm(v, w):
        return v / jnp.sqrt(jnp.mean(v * v, -1, keepdims=True) + EPS) * w

    def silu(v):
        return v * jax.nn.sigmoid(v)

    hn = rmsnorm(h, p["norm_w"])
    xz = hn @ p["w_inproj"] + p["b_inproj"]
    x_in, z = xz[:, :D_INNER], xz[:, D_INNER:]
    # causal depthwise conv at seq_len==1: only the last tap touches real data
    x_conv = silu(x_in * p["conv_w"][D_CONV - 1:D_CONV, :] + p["conv_b"])
    x_db = x_conv @ p["w_xproj"]
    dt_low = x_db[:, :DT_RANK]
    B_t = x_db[:, DT_RANK:DT_RANK + D_STATE]
    C_t = x_db[:, DT_RANK + D_STATE:]
    dt = jax.nn.softplus(dt_low @ p["w_dt"] + p["b_dt"])
    A = -jnp.exp(p["A_log"])
    state = (jnp.zeros((b, D_INNER, D_STATE)) * jnp.exp(dt[:, :, None] * A[None])
             + x_conv[:, :, None] * (dt[:, :, None] * B_t[:, None, :]))
    y = jnp.sum(state * C_t[:, None, :], -1)
    y = (y + p["D"] * x_conv) * silu(z)
    h = h + (y @ p["w_out"] + p["b_out"])
    h = rmsnorm(h, p["normf_w"])
    return h @ p["w_head"] + p["b_head"]


if __name__ == "__main__":
    key = jax.random.PRNGKey(0)
    k_x, k_p, k_x2, k_x3 = jax.random.split(key, 4)
    params = make_params(k_p)
    packed = pack_params(params)

    # kernel uses bf16 I/O -> compare against the f32 reference with a
    # tolerance that covers bf16 input/output rounding (~0.4% relative).
    RTOL, ATOL = 2e-2, 2e-2

    # NCHW image input, as in PyTorch: (B, 1, 8, 8), small batch
    x_img = jax.random.normal(k_x, (BATCH, 1, 8, 8), jnp.float32)
    logits = mamba_mnist_forward(x_img, packed)
    jax.block_until_ready(logits)
    ref = reference_forward(x_img, params)
    np.testing.assert_allclose(np.asarray(logits), np.asarray(ref),
                               rtol=RTOL, atol=ATOL)
    assert logits.shape == (BATCH, NUM_CLASSES)

    # ragged batch: now padded only to a multiple of 16 rows (single tile)
    x_big = jax.random.normal(k_x2, (272, 1, 8, 8), jnp.float32)
    logits_big = mamba_mnist_forward(x_big, packed)
    jax.block_until_ready(logits_big)
    ref_big = reference_forward(x_big, params)
    np.testing.assert_allclose(np.asarray(logits_big), np.asarray(ref_big),
                               rtol=RTOL, atol=ATOL)
    assert logits_big.shape == (272, NUM_CLASSES)

    # larger batch: exercises the multi-tile (grid=2) + minimal padding path
    x_med = jax.random.normal(k_x3, (600, 1, 8, 8), jnp.float32)
    logits_med = mamba_mnist_forward(x_med, packed)
    jax.block_until_ready(logits_med)
    ref_med = reference_forward(x_med, params)
    np.testing.assert_allclose(np.asarray(logits_med), np.asarray(ref_med),
                               rtol=RTOL, atol=ATOL)
    assert logits_med.shape == (600, NUM_CLASSES)

    print("KERNEL_OK")
</pallas_src>

<mosaic_0001>
module attributes {stable_mosaic.version = 11 : i64} {
  func.func @mamba_mnist_kernel(%arg0: i32, %arg1: memref<16x64xbf16, #tpu.memory_space<vmem>>, %arg2: memref<88x128xf32, #tpu.memory_space<vmem>>, %arg3: memref<16x128xbf16, #tpu.memory_space<vmem>>) attributes {dimension_semantics = [#tpu.dimension_semantics<parallel>], iteration_bounds = array<i64: 1>, scalar_prefetch = 0 : i64, scratch_operands = 0 : i64, tpu.core_type = #tpu.core_type<tc>, window_params = [{transform_indices = @transform_0, window_bounds = array<i64: 16, 64>}, {pipeline_mode = #tpu.pipeline_mode<synchronous>, transform_indices = @transform_1, window_bounds = array<i64: 88, 128>}, {transform_indices = @transform_2, window_bounds = array<i64: 16, 128>}]} {
    %c0 = arith.constant 0 : index
    %c0_0 = arith.constant 0 : index
    %0 = vector.load %arg1[%c0, %c0_0] : memref<16x64xbf16, #tpu.memory_space<vmem>>, vector<16x64xbf16>
    %1 = arith.extf %0 : vector<16x64xbf16> to vector<16x64xf32>
    %c0_1 = arith.constant 0 : index
    %c0_2 = arith.constant 0 : index
    %2 = vector.load %arg2[%c0_1, %c0_2] : memref<88x128xf32, #tpu.memory_space<vmem>>, vector<64x16xf32>
    %cst = arith.constant dense<0.000000e+00> : vector<16x16xf32>
    %3 = tpu.matmul %1, %2, %cst {dimension_numbers = #tpu.dot_dimension_numbers<[1], [0], [0], [1], [0, 0, 1, 1], [], []>} : vector<16x64xf32>, vector<64x16xf32>, vector<16x16xf32> -> vector<16x16xf32>
    %c81 = arith.constant 81 : index
    %c0_3 = arith.constant 0 : index
    %4 = vector.load %arg2[%c81, %c0_3] : memref<88x128xf32, #tpu.memory_space<vmem>>, vector<1x16xf32>
    %5 = vector.broadcast %4 : vector<1x16xf32> to vector<16x16xf32>
    %6 = arith.addf %3, %5 : vector<16x16xf32>
    %7 = arith.mulf %6, %6 : vector<16x16xf32>
    %cst_4 = arith.constant dense<0.000000e+00> : vector<16xf32>
    %8 = vector.multi_reduction <add>, %7, %cst_4 [1] : vector<16x16xf32> to vector<16xf32>
    %9 = vector.shape_cast %8 : vector<16xf32> to vector<16x1xf32>
    %cst_5 = arith.constant 1.600000e+01 : f32
    %10 = vector.broadcast %cst_5 : f32 to vector<16x1xf32>
    %11 = arith.divf %9, %10 : vector<16x1xf32>
    %cst_6 = arith.constant 9.99999997E-7 : f32
    %12 = vector.broadcast %cst_6 : f32 to vector<16x1xf32>
    %13 = arith.addf %11, %12 : vector<16x1xf32>
    %14 = math.rsqrt %13 : vector<16x1xf32>
    %15 = vector.broadcast %14 : vector<16x1xf32> to vector<16x16xf32>
    %16 = arith.mulf %6, %15 : vector<16x16xf32>
    %c0_7 = arith.constant 0 : index
    %c64 = arith.constant 64 : index
    %17 = vector.load %arg2[%c0_7, %c64] : memref<88x128xf32, #tpu.memory_space<vmem>>, vector<16x64xf32>
    %cst_8 = arith.constant dense<0.000000e+00> : vector<16x64xf32>
    %18 = tpu.matmul %16, %17, %cst_8 {dimension_numbers = #tpu.dot_dimension_numbers<[1], [0], [0], [1], [0, 0, 1, 1], [], []>} : vector<16x16xf32>, vector<16x64xf32>, vector<16x64xf32> -> vector<16x64xf32>
    %19 = vector.extract_strided_slice %18 {offsets = [0, 0], sizes = [16, 32], strides = [1, 1]} : vector<16x64xf32> to vector<16x32xf32>
    %c80 = arith.constant 80 : index
    %c0_9 = arith.constant 0 : index
    %20 = vector.load %arg2[%c80, %c0_9] : memref<88x128xf32, #tpu.memory_space<vmem>>, vector<1x32xf32>
    %21 = vector.broadcast %20 : vector<1x32xf32> to vector<16x32xf32>
    %22 = arith.addf %19, %21 : vector<16x32xf32>
    %23 = arith.negf %22 : vector<16x32xf32>
    %24 = math.exp %23 : vector<16x32xf32>
    %cst_10 = arith.constant 1.000000e+00 : f32
    %25 = vector.broadcast %cst_10 : f32 to vector<16x32xf32>
    %26 = arith.addf %25, %24 : vector<16x32xf32>
    %27 = arith.divf %25, %26 : vector<16x32xf32>
    %28 = arith.mulf %22, %27 : vector<16x32xf32>
    %29 = vector.extract_strided_slice %18 {offsets = [0, 32], sizes = [16, 32], strides = [1, 1]} : vector<16x64xf32> to vector<16x32xf32>
    %c80_11 = arith.constant 80 : index
    %c32 = arith.constant 32 : index
    %30 = vector.load %arg2[%c80_11, %c32] : memref<88x128xf32, #tpu.memory_space<vmem>>, vector<1x32xf32>
    %31 = vector.broadcast %30 : vector<1x32xf32> to vector<16x32xf32>
    %32 = arith.addf %29, %31 : vector<16x32xf32>
    %c16 = arith.constant 16 : index
    %c64_12 = arith.constant 64 : index
    %33 = vector.load %arg2[%c16, %c64_12] : memref<88x128xf32, #tpu.memory_space<vmem>>, vector<32x64xf32>
    %cst_13 = arith.constant dense<0.000000e+00> : vector<16x64xf32>
    %34 = tpu.matmul %28, %33, %cst_13 {dimension_numbers = #tpu.dot_dimension_numbers<[1], [0], [0], [1], [0, 0, 1, 1], [], []>} : vector<16x32xf32>, vector<32x64xf32>, vector<16x64xf32> -> vector<16x64xf32>
    %35 = vector.extract_strided_slice %34 {offsets = [0, 0], sizes = [16, 32], strides = [1, 1]} : vector<16x64xf32> to vector<16x32xf32>
    %c80_14 = arith.constant 80 : index
    %c64_15 = arith.constant 64 : index
    %36 = vector.load %arg2[%c80_14, %c64_15] : memref<88x128xf32, #tpu.memory_space<vmem>>, vector<1x32xf32>
    %37 = vector.broadcast %36 : vector<1x32xf32> to vector<16x32xf32>
    %38 = arith.addf %35, %37 : vector<16x32xf32>
    %cst_16 = arith.constant 0.000000e+00 : f32
    %39 = vector.broadcast %cst_16 : f32 to vector<16x32xf32>
    %40 = arith.maximumf %38, %39 : vector<16x32xf32>
    %41 = vector.broadcast %cst_16 : f32 to vector<16x32xf32>
    %42 = arith.subf %38, %41 : vector<16x32xf32>
    %43 = arith.cmpf one, %42, %42 : vector<16x32xf32>
    %44 = vector.broadcast %cst_16 : f32 to vector<16x32xf32>
    %45 = arith.addf %38, %44 : vector<16x32xf32>
    %46 = math.absf %42 : vector<16x32xf32>
    %cst_17 = arith.constant 0.000000e+00 : f32
    %47 = vector.broadcast %cst_17 : f32 to vector<16x32xf32>
    %48 = arith.subf %47, %46 : vector<16x32xf32>
    %49 = math.exp %48 : vector<16x32xf32>
    %50 = math.log1p %49 : vector<16x32xf32>
    %51 = arith.addf %40, %50 : vector<16x32xf32>
    %52 = arith.select %43, %45, %51 : vector<16x32xi1>, vector<16x32xf32>
    %53 = vector.extract_strided_slice %34 {offsets = [0, 32], sizes = [16, 32], strides = [1, 1]} : vector<16x64xf32> to vector<16x32xf32>
    %54 = arith.mulf %53, %28 : vector<16x32xf32>
    %cst_18 = arith.constant dense<0.000000e+00> : vector<16xf32>
    %55 = vector.multi_reduction <add>, %54, %cst_18 [1] : vector<16x32xf32> to vector<16xf32>
    %56 = vector.shape_cast %55 : vector<16xf32> to vector<16x1xf32>
    %57 = vector.broadcast %56 : vector<16x1xf32> to vector<16x32xf32>
    %58 = arith.mulf %52, %57 : vector<16x32xf32>
    %c80_19 = arith.constant 80 : index
    %c96 = arith.constant 96 : index
    %59 = vector.load %arg2[%c80_19, %c96] : memref<88x128xf32, #tpu.memory_space<vmem>>, vector<1x32xf32>
    %60 = vector.broadcast %59 : vector<1x32xf32> to vector<16x32xf32>
    %61 = arith.addf %58, %60 : vector<16x32xf32>
    %62 = arith.mulf %28, %61 : vector<16x32xf32>
    %63 = arith.negf %32 : vector<16x32xf32>
    %64 = math.exp %63 : vector<16x32xf32>
    %cst_20 = arith.constant 1.000000e+00 : f32
    %65 = vector.broadcast %cst_20 : f32 to vector<16x32xf32>
    %66 = arith.addf %65, %64 : vector<16x32xf32>
    %67 = arith.divf %65, %66 : vector<16x32xf32>
    %68 = arith.mulf %32, %67 : vector<16x32xf32>
    %69 = arith.mulf %62, %68 : vector<16x32xf32>
    %c0_21 = arith.constant 0 : index
    %c16_22 = arith.constant 16 : index
    %70 = vector.load %arg2[%c0_21, %c16_22] : memref<88x128xf32, #tpu.memory_space<vmem>>, vector<32x16xf32>
    %cst_23 = arith.constant dense<0.000000e+00> : vector<16x16xf32>
    %71 = tpu.matmul %69, %70, %cst_23 {dimension_numbers = #tpu.dot_dimension_numbers<[1], [0], [0], [1], [0, 0, 1, 1], [], []>} : vector<16x32xf32>, vector<32x16xf32>, vector<16x16xf32> -> vector<16x16xf32>
    %c81_24 = arith.constant 81 : index
    %c16_25 = arith.constant 16 : index
    %72 = vector.load %arg2[%c81_24, %c16_25] : memref<88x128xf32, #tpu.memory_space<vmem>>, vector<1x16xf32>
    %73 = vector.broadcast %72 : vector<1x16xf32> to vector<16x16xf32>
    %74 = arith.addf %71, %73 : vector<16x16xf32>
    %75 = arith.addf %6, %74 : vector<16x16xf32>
    %76 = arith.mulf %75, %75 : vector<16x16xf32>
    %cst_26 = arith.constant dense<0.000000e+00> : vector<16xf32>
    %77 = vector.multi_reduction <add>, %76, %cst_26 [1] : vector<16x16xf32> to vector<16xf32>
    %78 = vector.shape_cast %77 : vector<16xf32> to vector<16x1xf32>
    %cst_27 = arith.constant 1.600000e+01 : f32
    %79 = vector.broadcast %cst_27 : f32 to vector<16x1xf32>
    %80 = arith.divf %78, %79 : vector<16x1xf32>
    %cst_28 = arith.constant 9.99999997E-7 : f32
    %81 = vector.broadcast %cst_28 : f32 to vector<16x1xf32>
    %82 = arith.addf %80, %81 : vector<16x1xf32>
    %83 = math.rsqrt %82 : vector<16x1xf32>
    %84 = vector.broadcast %83 : vector<16x1xf32> to vector<16x16xf32>
    %85 = arith.mulf %75, %84 : vector<16x16xf32>
    %c64_29 = arith.constant 64 : index
    %c0_30 = arith.constant 0 : index
    %86 = vector.load %arg2[%c64_29, %c0_30] : memref<88x128xf32, #tpu.memory_space<vmem>>, vector<16x128xf32>
    %cst_31 = arith.constant dense<0.000000e+00> : vector<16x128xf32>
    %87 = tpu.matmul %85, %86, %cst_31 {dimension_numbers = #tpu.dot_dimension_numbers<[1], [0], [0], [1], [0, 0, 1, 1], [], []>} : vector<16x16xf32>, vector<16x128xf32>, vector<16x128xf32> -> vector<16x128xf32>
    %c82 = arith.constant 82 : index
    %c0_32 = arith.constant 0 : index
    %88 = vector.load %arg2[%c82, %c0_32] : memref<88x128xf32, #tpu.memory_space<vmem>>, vector<1x128xf32>
    %89 = vector.broadcast %88 : vector<1x128xf32> to vector<16x128xf32>
    %90 = arith.addf %87, %89 : vector<16x128xf32>
    %91 = arith.truncf %90 : vector<16x128xf32> to vector<16x128xbf16>
    %c0_33 = arith.constant 0 : index
    %c0_34 = arith.constant 0 : index
    %92 = vector.load %arg3[%c0_33, %c0_34] : memref<16x128xbf16, #tpu.memory_space<vmem>>, vector<16x128xbf16>
    tpu.vector_store %arg3[%c0_33, %c0_34], %91 {strides = array<i32>} : memref<16x128xbf16, #tpu.memory_space<vmem>>, vector<16x128xbf16>,
    return
  }
  func.func @transform_0(%arg0: i32) -> (i32, i32) {
    %c0_i32 = arith.constant 0 : i32
    %c0_i32_0 = arith.constant 0 : i32
    return %arg0, %c0_i32 : i32, i32
  }
  func.func @transform_1(%arg0: i32) -> (i32, i32) {
    %c0_i32 = arith.constant 0 : i32
    %c0_i32_0 = arith.constant 0 : i32
    %c0_i32_1 = arith.constant 0 : i32
    return %c0_i32, %c0_i32_0 : i32, i32
  }
  func.func @transform_2(%arg0: i32) -> (i32, i32) {
    %c0_i32 = arith.constant 0 : i32
    %c0_i32_0 = arith.constant 0 : i32
    return %arg0, %c0_i32 : i32, i32
  }
}

</mosaic_0001>

<bundles_post_ra>
// kernel: _forward_padded.1
= control target key start
LH: loop header
LB: loop body
LE: loop exit
PB: predicated region body
PF: predicated region fallthrough
CT: control target
= control target key end

     0   :  { %7 = vsyncpa [#allocation3], 0  ;;  %s758_s0 = inlined_call_operand.hbm [shape: bf16[16,64], index: 0, kind: input, shape index: {}]   ;;  %s759_s1 = inlined_call_operand.hbm [shape: f32[88,128], index: 1, kind: input, shape index: {}]   ;;  %s760_s2 = inlined_call_operand.hbm [shape: bf16[16,128], index: 2, kind: output, shape index: {}]  }
   0x1   :  { %8 = vsyncpa [#allocation6], 0 }
   0x2   :  { %9 = vsyncpa [#allocation4], 0  ;;  %s14_s11 = sshll.u32 %s758_s0, 4  ;;  %s656_s12 = smov [#allocation2]   ;;  %s15_s11 = int_to_ptr.hbm [resolvable:$true] %s14_s11 }
   0x3   :  { %s16_s13 = sshll.u32 %s656_s12, 4  ;;  %s27_s16 = sshll.u32 %s759_s1, 4  ;;  %s17_s13 = int_to_ptr.vmem [resolvable:$true] %s16_s13  ;;  %s28_s16 = int_to_ptr.hbm [resolvable:$true] %s27_s16 }
   0x4   :  { %s657_s17 = smov 64   ;;  %s658_s18 = smov 4  }
   0x5   :  { %22 = dma.hbm_to_vmem [thread:$0]  %s15_s11, 128, %s17_s13, [#allocation3], %s657_s17, %s657_s17, %s658_s18  }
   0x6   :  { %s659_s19 = smov [#allocation5]   ;;  %s660_s21 = smov 128  }
   0x7   :  { %s29_s20 = sshll.u32 %s659_s19, 4  ;;  %s661_s0 = smov 8   ;;  %s30_s20 = int_to_ptr.vmem [resolvable:$true] %s29_s20 }
   0x8   :  { %35 = dma.hbm_to_vmem [thread:$0]  %s28_s16, 1408, %s30_s20, [#allocation6], %s660_s21, %s660_s21, %s661_s0  }
   0x9   :  { %650 = dma.done.wait [#allocation3], 128  }
   0xa   :  { %651 = vsyncadd [#allocation3], 4294967168 }
   0xb   :  { %652 = dma.done.wait [#allocation6], 1408  }
   0xc   :  { %653 = vsyncadd [#allocation6], 4294965888  ;;  %v55_v0 = vld [vmem:[#allocation5 + $0x38] sm:$0xff]  ;;  %v54_v1 = vld [vmem:[#allocation5 + $0x30] sm:$0xff]  ;;  %vm58_vm0 = vcmask 523264   ;;  %vm90_vm1 = vcmask 130048  }
   0xd   :  { %73 = vmatpush.msra.mxu0 %v55_v0  ;;  %v53_v2 = vld [vmem:[#allocation5 + $0x28] sm:$0xff]  ;;  %v52_v3 = vld [vmem:[#allocation5 + $0x20] sm:$0xff]  ;;  %v51_v4 = vld [vmem:[#allocation5 + $0x18] sm:$0xff]  ;;  %v662_v21 = vmov 16.0   ;;  %vm233_vm13 = vcmask 261120   ;;  %s663_s1 = smov 32  }
   0xe   :  { %v50_v5 = vld [vmem:[#allocation5 + $0x10] sm:$0xff]  ;;  %v503_v6 = vld [vmem:[#allocation2] sm:$0xff]   ;;  %v49_v7 = vld [vmem:[#allocation5 + $0x8] sm:$0xff]  ;;  %552 = vrcp.f32 %v662_v21  ;;  %v529_v33 = vpack.i.bf16 %v52_v3, %v53_v2  ;;  %s664_s22 = smov 96   ;;  %s665_s23 = smov 112  }
   0xf   :  { %74 = vmatpush.msra.mxu0 %v54_v1  ;;  %v48_v8 = vld [vmem:[#allocation5] sm:$0xff]  ;;  %v504_v9 = vunpack.c.l.bf16 %v503_v6  ;;  %v505_v10 = vunpack.c.h.bf16 %v503_v6  ;;  %v695_v12 = vld [vmem:[#allocation5 + $0x51] ss:$0 sm:$0xff]  ;;  %v712_v34 = vpack.i.bf16 %v50_v5, %v51_v4  ;;  %v550_v61 = vld [vmem:[#allocation5 + $0x50] ss:$0 sm:$0xff]  ;;  %s666_s24 = smov [#allocation7]  }
  0x10   :  { %v691_v11 = vpack.i.bf16 %v48_v8, %v49_v7  ;;  %s474_s25 = sshll.u32 %s666_s24, 4  ;;  %s476_s28 = sshll.u32 %s760_s2, 4  ;;  %s475_s25 = int_to_ptr.vmem [resolvable:$true] %s474_s25  ;;  %s477_s28 = int_to_ptr.hbm [resolvable:$true] %s476_s28 }
  0x11   :  { %75 = vmatpush.msra.mxu0 %v53_v2  ;;  %535 = vrot.lane.b32.xlu2 %v712_v34, %s657_s17 }
  0x12   :  { %525 = vrot.lane.b32.xlu1 %v691_v11, %s657_s17 }
  0x13   :  { %76 = vmatpush.msra.mxu0 %v52_v3 }
  0x14   :  { %v553_v22 = vpop.eup %552 }
  0x15   :  { %77 = vmatpush.msra.mxu0 %v51_v4  ;;  %v98_v23 = vmul.f32 16.0, %v553_v22  ;;  %vm102_vm2 = vweird.f32 %v553_v22 }
  0x17   :  { %78 = vmatpush.msra.mxu0 %v50_v5  ;;  %v99_v25 = vsub.f32 1.0, %v98_v23 }
  0x19   :  { %79 = vmatpush.msra.mxu0 %v49_v7  ;;  %v100_v28 = vmul.f32 %v553_v22, %v99_v25 }
  0x1a   :  { %530 = vrot.lane.b32.xlu1 %v529_v33, %s657_s17 }
  0x1b   :  { %80 = vmatpush.msra.mxu0 %v48_v8  ;;  %v101_v29 = vadd.f32 %v553_v22, %v100_v28 }
  0x1c   :  { %490 = vmatmul.msk.f32.vlgmr.msra.gmra.mxu0 %vm58_vm0, %v504_v9 }
  0x1d   :  { %v709_v30 = vsel %vm102_vm2, %v553_v22, %v101_v29 }
  0x24   :  { %491 = vmatmul.msk.f32.gmra.mxu0 %vm58_vm0, %v505_v10 }
  0x6b   :  { %v536_v58 = vpop.permute.xlu2 %535 }
  0x6c   :  { %v537_v59 = vunpack.i.l.bf16 %v536_v58  ;;  %v538_v60 = vunpack.i.h.bf16 %v536_v58 }
  0x84   :  { %v526_v24 = vpop.permute.xlu1 %525 }
  0x85   :  { %v527_v26 = vunpack.i.l.bf16 %v526_v24  ;;  %v528_v27 = vunpack.i.h.bf16 %v526_v24 }
  0x87   :  { %160 = vmatpush.msra.mxu1 %v527_v26  ;;  %511 = vmatpush.msra.mxu2 %v527_v26 }
  0x89   :  { %161 = vmatpush.msra.mxu1 %v528_v27  ;;  %512 = vmatpush.msra.mxu2 %v528_v27 }
  0x8c   :  { %v531_v55 = vpop.permute.xlu1 %530 }
  0x8d   :  { %v532_v56 = vunpack.i.l.bf16 %v531_v55  ;;  %v533_v57 = vunpack.i.h.bf16 %v531_v55 }
  0x8f   :  { %252 = vmatpush.msrb.mxu2 %v532_v56 }
  0x91   :  { %253 = vmatpush.msrb.mxu2 %v533_v57 }
  0x93   :  { %254 = vmatpush.msrb.mxu2 %v537_v59 }
  0x95   :  { %255 = vmatpush.msrb.mxu2 %v538_v60 }
  0x99   :  { %v82_v13 = vpop.f32.mrf.mxu0 }
  0x9a   :  { %v698_v14 = vadd.f32 %v695_v12, %v82_v13 }
  0x9c   :  { %v88_v15 = vmul.f32 %v698_v14, %v698_v14 }
  0x9e   :  { %v91_v16 = vsel %vm90_vm1, %v88_v15, 0.0 }
  0x9f   :  { %92 = vadd.xlane.f32.xlu0 %v91_v16 }
  0xa1   :  { %v85_v17 = vpop.f32.mrf.mxu0 }
  0xa2   :  { %v704_v18 = vadd.f32 %v695_v12, %v85_v17 }
  0xa4   :  { %v89_v19 = vmul.f32 %v704_v18, %v704_v18 }
  0xa6   :  { %v94_v20 = vsel %vm90_vm1, %v89_v19, 0.0 }
  0xa7   :  { %95 = vadd.xlane.f32.xlu0 %v94_v20 }
 0x112   :  { %v93_v31 = vpop.xlane.xlu0 %92 }
 0x113   :  { %v104_v32 = vmul.f32 %v709_v30, %v93_v31 }
 0x115   :  { %v106_v35 = vadd.f32 1e-06, %v104_v32 }
 0x117   :  { %554 = vrsqrt.f32 %v106_v35  ;;  %vm114_vm4 = vweird.f32 %v106_v35 }
 0x11a   :  { %v96_v36 = vpop.xlane.xlu0 %95 }
 0x11b   :  { %v105_v37 = vmul.f32 %v709_v30, %v96_v36 }
 0x11d   :  { %v555_v38 = vpop.eup %554  ;;  %v107_v39 = vadd.f32 1e-06, %v105_v37 }
 0x11e   :  { %v109_v40 = vmul.f32 %v555_v38, %v106_v35  ;;  %vm115_vm3 = vweird.f32 %v555_v38 }
 0x11f   :  { %556 = vrsqrt.f32 %v107_v39  ;;  %vm116_vm5 = vmor %vm114_vm4, %vm115_vm3  ;;  %vm124_vm6 = vweird.f32 %v107_v39 }
 0x120   :  { %v110_v41 = vmul.f32 %v555_v38, %v109_v40 }
 0x122   :  { %v111_v42 = vmul.f32 0.5, %v110_v41 }
 0x124   :  { %v112_v43 = vsub.f32 1.5, %v111_v42 }
 0x125   :  { %v557_v44 = vpop.eup %556 }
 0x126   :  { %v119_v45 = vmul.f32 %v557_v44, %v107_v39  ;;  %v113_v46 = vmul.f32 %v555_v38, %v112_v43  ;;  %vm125_vm7 = vweird.f32 %v557_v44 }
 0x127   :  { %vm126_vm8 = vmor %vm124_vm6, %vm125_vm7 }
 0x128   :  { %v120_v47 = vmul.f32 %v557_v44, %v119_v45  ;;  %v117_v48 = vsel %vm116_vm5, %v555_v38, %v113_v46 }
 0x129   :  { %v128_v49 = vmul.f32 %v117_v48, %v698_v14 }
 0x12a   :  { %v121_v50 = vmul.f32 0.5, %v120_v47 }
 0x12b   :  { %492 = vmatmul.msk.f32.vlgmr.msra.gmra.mxu1 %vm90_vm1, %v128_v49 }
 0x12c   :  { %v122_v51 = vsub.f32 1.5, %v121_v50 }
 0x12e   :  { %v123_v52 = vmul.f32 %v557_v44, %v122_v51 }
 0x130   :  { %v127_v53 = vsel %vm126_vm8, %v557_v44, %v123_v52 }
 0x131   :  { %v129_v54 = vmul.f32 %v127_v53, %v704_v18 }
 0x133   :  { %493 = vmatmul.msk.f32.vlgmr.msra.gmra.mxu2 %vm90_vm1, %v129_v54 }
 0x1a8   :  { %v163_v62 = vpop.f32.mrf.mxu1 }
 0x1a9   :  { %v171_v63 = vadd.f32 %v550_v61, %v163_v62 }
 0x1ab   :  { %v494_v0 = vmul.f32 -1.442695, %v171_v63 }
 0x1ad   :  { %558 = vpow2.f32 %v494_v0 }
 0x1b3   :  { %v559_v1 = vpop.eup %558 }
 0x1b4   :  { %v179_v2 = vadd.f32 1.0, %v559_v1 }
 0x1b6   :  { %560 = vrcp.f32 %v179_v2  ;;  %v166_v3 = vpop.f32.mrf.mxu2  ;;  %v192_v9 = vand.u32 2147483648, %v179_v2  ;;  %v190_v15 = vand.u32 2147483647, %v179_v2  ;;  %vm186_vm10 = vweird.f32 %v179_v2 }
 0x1b7   :  { %v172_v4 = vadd.f32 %v550_v61, %v166_v3 }
 0x1b8   :  { %v193_v19 = vor.u32 1.1754944e-38, %v192_v9  ;;  %vm191_vm12 = vcmp.eq.f32.partialorder %v190_v15, 8.507059e+37 }
 0x1b9   :  { %v495_v5 = vmul.f32 -1.442695, %v172_v4 }
 0x1bb   :  { %562 = vpow2.f32 %v495_v5 }
 0x1bc   :  { %v561_v6 = vpop.eup %560 }
 0x1bd   :  { %v182_v7 = vmul.f32 %v561_v6, %v179_v2  ;;  %vm187_vm9 = vweird.f32 %v561_v6 }
 0x1be   :  { %vm188_vm11 = vmor %vm186_vm10, %vm187_vm9 }
 0x1bf   :  { %v183_v8 = vsub.f32 1.0, %v182_v7 }
 0x1c1   :  { %v563_v10 = vpop.eup %562  ;;  %v184_v13 = vmul.f32 %v561_v6, %v183_v8 }
 0x1c2   :  { %v180_v16 = vadd.f32 1.0, %v563_v10 }
 0x1c3   :  { %v185_v17 = vadd.f32 %v561_v6, %v184_v13 }
 0x1c4   :  { %564 = vrcp.f32 %v180_v16  ;;  %v207_v26 = vand.u32 2147483648, %v180_v16  ;;  %v205_v28 = vand.u32 2147483647, %v180_v16  ;;  %vm201_vm15 = vweird.f32 %v180_v16 }
 0x1c5   :  { %v189_v20 = vsel %vm188_vm11, %v561_v6, %v185_v17 }
 0x1c6   :  { %v194_v21 = vsel %vm191_vm12, %v193_v19, %v189_v20  ;;  %v208_v31 = vor.u32 1.1754944e-38, %v207_v26  ;;  %vm206_vm2 = vcmp.eq.f32.partialorder %v205_v28, 8.507059e+37 }
 0x1c7   :  { %v722_v22 = vmul.f32 %v194_v21, %v171_v63 }
 0x1c9   :  { %305 = vrot.lane.b32.xlu2 %v722_v22, %s663_s1  ;;  %496 = vmatmul.msk.f32.vlgmr.msrb.gmra.mxu2 %vm233_vm13, %v722_v22 }
 0x1ca   :  { %v565_v23 = vpop.eup %564 }
 0x1cb   :  { %v197_v24 = vmul.f32 %v565_v23, %v180_v16  ;;  %vm202_vm14 = vweird.f32 %v565_v23 }
 0x1cc   :  { %vm203_vm0 = vmor %vm201_vm15, %vm202_vm14 }
 0x1cd   :  { %v198_v25 = vsub.f32 1.0, %v197_v24 }
 0x1cf   :  { %v199_v27 = vmul.f32 %v565_v23, %v198_v25 }
 0x1d1   :  { %v200_v29 = vadd.f32 %v565_v23, %v199_v27 }
 0x1d3   :  { %v204_v32 = vsel %vm203_vm0, %v565_v23, %v200_v29 }
 0x1d4   :  { %v209_v33 = vsel %vm206_vm2, %v208_v31, %v204_v32 }
 0x1d5   :  { %v727_v35 = vmul.f32 %v209_v33, %v172_v4 }
 0x1d7   :  { %307 = vrot.lane.b32.xlu0 %v727_v35, %s663_s1  ;;  %497 = vmatmul.msk.f32.gmra.mxu2 %vm233_vm13, %v727_v35 }
 0x1df   :  { %329 = vrot.lane.b32.xlu0 %v550_v61, %s663_s1 }
 0x1e7   :  { %336 = vrot.lane.b32.xlu0 %v722_v22, %s664_s22 }
 0x1ef   :  { %338 = vrot.lane.b32.xlu0 %v727_v35, %s664_s22 }
 0x1f7   :  { %365 = vrot.lane.b32.xlu0 %v695_v12, %s665_s23 }
 0x223   :  { %v306_v36 = vpop.permute.xlu2 %305 }
 0x249   :  { %v308_v39 = vpop.permute.xlu0 %307 }
 0x24c   :  { %v257_v37 = vpop.f32.mrf.mxu2 }
 0x24d   :  { %v311_v38 = vmul.f32 %v306_v36, %v257_v37 }
 0x24f   :  { %315 = vrot.lane.b32.xlu1 %v311_v38, %s664_s22 }
 0x251   :  { %v330_v13 = vpop.permute.xlu0 %329 }
 0x257   :  { %264 = vrot.lane.b32.xlu1 %v550_v61, %s657_s17 }
 0x259   :  { %v337_v29 = vpop.permute.xlu0 %336 }
 0x25a   :  { %v260_v40 = vpop.f32.mrf.mxu2 }
 0x25b   :  { %v312_v41 = vmul.f32 %v308_v39, %v260_v40 }
 0x25d   :  { %317 = vrot.lane.b32.xlu2 %v312_v41, %s664_s22 }
 0x25f   :  { %540 = vrot.lane.b32.xlu1 %v712_v34, %s665_s23 }
 0x267   :  { %545 = vrot.lane.b32.xlu1 %v691_v11, %s665_s23 }
 0x2b7   :  { %v318_v42 = vpop.permute.xlu2 %317 }
 0x2b8   :  { %v324_v43 = vsel %vm233_vm13, %v318_v42, 0.0 }
 0x2b9   :  { %325 = vadd.xlane.f32.xlu1 %v324_v43 }
 0x2c1   :  { %v316_v44 = vpop.permute.xlu1 %315 }
 0x2c2   :  { %v321_v12 = vsel %vm233_vm13, %v316_v44, 0.0 }
 0x2c3   :  { %322 = vadd.xlane.f32.xlu2 %v321_v12 }
 0x2c9   :  { %v265_v45 = vpop.permute.xlu1 %264 }
 0x2ca   :  { %v267_v11 = vadd.f32 %v265_v45, %v257_v37  ;;  %v268_v34 = vadd.f32 %v265_v45, %v260_v40  ;;  %v339_v37 = vpop.permute.xlu0 %338 }
 0x2cc   :  { %v275_v52 = vand.u32 2147483647, %v267_v11  ;;  %v276_v53 = vand.u32 2147483647, %v268_v34  ;;  %v269_v15 = vmax.f32 %v267_v11, 0.0  ;;  %v270_v17 = vmax.f32 %v268_v34, 0.0 }
 0x2cd   :  { %vm271_vm5 = vcmp.ne.f32.partialorder %v267_v11, %v267_v11  ;;  %vm272_vm6 = vcmp.ne.f32.partialorder %v268_v34, %v268_v34 }
 0x2ce   :  { %v277_v54 = vsub.f32 0.0, %v275_v52  ;;  %v278_v55 = vsub.f32 0.0, %v276_v53 }
 0x2d0   :  { %v279_v56 = vmul.f32 1.442695, %v277_v54  ;;  %v281_v57 = vmul.f32 1.442695, %v278_v55 }
 0x2d1   :  { %v541_v46 = vpop.permute.xlu1 %540 }
 0x2d2   :  { %v542_v47 = vunpack.i.l.bf16 %v541_v46  ;;  %v543_v48 = vunpack.i.h.bf16 %v541_v46  ;;  %566 = vpow2.f32 %v279_v56  ;;  %v366_v39 = vpop.permute.xlu0 %365 }
 0x2d3   :  { %568 = vpow2.f32 %v281_v57 }
 0x2d4   :  { %386 = vmatpush.msra.mxu3 %v542_v47  ;;  %v434_v47 = vld [vmem:[#allocation5 + $0x48] sm:$0xff] }
 0x2d5   :  { %457 = vmatpush.msrb.mxu1 %v434_v47 }
 0x2d6   :  { %387 = vmatpush.msra.mxu3 %v543_v48  ;;  %v433_v48 = vld [vmem:[#allocation5 + $0x40] sm:$0xff] }
 0x2d7   :  { %458 = vmatpush.msrb.mxu1 %v433_v48 }
 0x2d8   :  { %v567_v58 = vpop.eup %566 }
 0x2d9   :  { %v546_v49 = vpop.permute.xlu1 %545  ;;  %v569_v59 = vpop.eup %568  ;;  %v283_v60 = vadd.f32 1.0, %v567_v58  ;;  %v286_v62 = vmul.f32 -0.5, %v567_v58  ;;  %v289_v3 = vand.u32 2147483647, %v567_v58 }
 0x2da   :  { %v547_v50 = vunpack.i.l.bf16 %v546_v49  ;;  %v548_v51 = vunpack.i.h.bf16 %v546_v49  ;;  %v292_v61 = vadd.f32 1.0, %v569_v59  ;;  %v295_v63 = vmul.f32 -0.5, %v569_v59 }
 0x2db   :  { %570 = vlog2.f32 %v283_v60  ;;  %v287_v1 = vadd.f32 1.0, %v286_v62  ;;  %v298_v6 = vand.u32 2147483647, %v569_v59  ;;  %vm290_vm3 = vcmp.lt.f32.partialorder %v289_v3, 0.0004427343 }
 0x2dc   :  { %388 = vmatpush.msra.mxu3 %v547_v50  ;;  %572 = vlog2.f32 %v292_v61  ;;  %v296_v4 = vadd.f32 1.0, %v295_v63  ;;  %v551_v3 = vld [vmem:[#allocation5 + $0x52] ss:$0 sm:$0xff] }
 0x2dd   :  { %v288_v8 = vmul.f32 %v567_v58, %v287_v1  ;;  %vm299_vm4 = vcmp.lt.f32.partialorder %v298_v6, 0.0004427343 }
 0x2de   :  { %389 = vmatpush.msra.mxu3 %v548_v51  ;;  %v297_v9 = vmul.f32 %v569_v59, %v296_v4 }
 0x2e1   :  { %v571_v0 = vpop.eup %570 }
 0x2e2   :  { %v573_v2 = vpop.eup %572  ;;  %v285_v5 = vmul.f32 0.6931472, %v571_v0 }
 0x2e3   :  { %v294_v7 = vmul.f32 0.6931472, %v573_v2 }
 0x2e4   :  { %v291_v10 = vsel %vm290_vm3, %v288_v8, %v285_v5 }
 0x2e5   :  { %v300_v16 = vsel %vm299_vm4, %v297_v9, %v294_v7  ;;  %v301_v19 = vadd.f32 %v291_v10, %v269_v15 }
 0x2e6   :  { %v302_v20 = vadd.f32 %v300_v16, %v270_v17 }
 0x2e7   :  { %v303_v23 = vsel %vm271_vm5, %v267_v11, %v301_v19 }
 0x2e8   :  { %v304_v26 = vsel %vm272_vm6, %v268_v34, %v302_v20 }
 0x32c   :  { %v326_v21 = vpop.xlane.xlu1 %325 }
 0x32d   :  { %v328_v27 = vmul.f32 %v326_v21, %v304_v26 }
 0x32f   :  { %v333_v32 = vadd.f32 %v330_v13, %v328_v27 }
 0x331   :  { %v335_v36 = vmul.f32 %v333_v32, %v727_v35 }
 0x333   :  { %v343_v38 = vmul.f32 %v339_v37, %v335_v36 }
 0x336   :  { %v323_v24 = vpop.xlane.xlu2 %322 }
 0x337   :  { %v327_v25 = vmul.f32 %v323_v24, %v303_v23 }
 0x339   :  { %v332_v28 = vadd.f32 %v330_v13, %v327_v25 }
 0x33b   :  { %v334_v31 = vmul.f32 %v332_v28, %v722_v22 }
 0x33d   :  { %v342_v33 = vmul.f32 %v337_v29, %v334_v31 }
 0x33f   :  { %498 = vmatmul.msk.f32.vlgmr.msra.gmra.mxu3 %vm233_vm13, %v342_v33 }
 0x347   :  { %499 = vmatmul.msk.f32.gmra.mxu3 %vm233_vm13, %v343_v38 }
 0x3c2   :  { %v391_v40 = vpop.f32.mrf.mxu3 }
 0x3c3   :  { %v392_v41 = vadd.f32 %v391_v40, %v366_v39 }
 0x3c5   :  { %v397_v42 = vadd.f32 %v392_v41, %v698_v14 }
 0x3c7   :  { %v399_v43 = vmul.f32 %v397_v42, %v397_v42 }
 0x3c9   :  { %v401_v44 = vsel %vm90_vm1, %v399_v43, 0.0 }
 0x3ca   :  { %402 = vadd.xlane.f32.xlu2 %v401_v44  ;;  %v394_v22 = vpop.f32.mrf.mxu3 }
 0x3cb   :  { %v395_v12 = vadd.f32 %v394_v22, %v366_v39 }
 0x3cd   :  { %v398_v45 = vadd.f32 %v395_v12, %v704_v18 }
 0x3cf   :  { %v400_v46 = vmul.f32 %v398_v45, %v398_v45 }
 0x3d1   :  { %v404_v35 = vsel %vm90_vm1, %v400_v46, 0.0 }
 0x3d2   :  { %405 = vadd.xlane.f32.xlu0 %v404_v35 }
 0x43d   :  { %v403_v49 = vpop.xlane.xlu2 %402 }
 0x43e   :  { %v407_v50 = vmul.f32 %v403_v49, %v709_v30 }
 0x440   :  { %v409_v14 = vadd.f32 1e-06, %v407_v50 }
 0x442   :  { %574 = vrsqrt.f32 %v409_v14  ;;  %vm417_vm8 = vweird.f32 %v409_v14 }
 0x445   :  { %v406_v51 = vpop.xlane.xlu0 %405 }
 0x446   :  { %v408_v11 = vmul.f32 %v406_v51, %v709_v30 }
 0x448   :  { %v575_v34 = vpop.eup %574  ;;  %v410_v52 = vadd.f32 1e-06, %v408_v11 }
 0x449   :  { %v412_v53 = vmul.f32 %v575_v34, %v409_v14  ;;  %vm418_vm7 = vweird.f32 %v575_v34 }
 0x44a   :  { %576 = vrsqrt.f32 %v410_v52  ;;  %vm419_vm9 = vmor %vm417_vm8, %vm418_vm7  ;;  %vm427_vm11 = vweird.f32 %v410_v52 }
 0x44b   :  { %v413_v18 = vmul.f32 %v575_v34, %v412_v53 }
 0x44d   :  { %v414_v54 = vmul.f32 0.5, %v413_v18 }
 0x44f   :  { %v415_v55 = vsub.f32 1.5, %v414_v54 }
 0x450   :  { %v577_v56 = vpop.eup %576 }
 0x451   :  { %v416_v57 = vmul.f32 %v575_v34, %v415_v55  ;;  %v422_v58 = vmul.f32 %v577_v56, %v410_v52  ;;  %vm428_vm10 = vweird.f32 %v577_v56 }
 0x452   :  { %vm429_vm12 = vmor %vm427_vm11, %vm428_vm10 }
 0x453   :  { %v423_v59 = vmul.f32 %v577_v56, %v422_v58  ;;  %v420_v60 = vsel %vm419_vm9, %v575_v34, %v416_v57 }
 0x454   :  { %v431_v61 = vmul.f32 %v420_v60, %v397_v42 }
 0x455   :  { %v424_v62 = vmul.f32 0.5, %v423_v59 }
 0x456   :  { %500 = vmatmul.msk.f32.vlgmr.msrb.gmra.mxu1 %vm90_vm1, %v431_v61 }
 0x457   :  { %v425_v30 = vsub.f32 1.5, %v424_v62 }
 0x459   :  { %v426_v63 = vmul.f32 %v577_v56, %v425_v30 }
 0x45b   :  { %v430_v0 = vsel %vm429_vm12, %v577_v56, %v426_v63 }
 0x45c   :  { %v432_v1 = vmul.f32 %v430_v0, %v398_v45 }
 0x45e   :  { %501 = vmatmul.msk.f32.gmra.mxu1 %vm90_vm1, %v432_v1 }
 0x4d3   :  { %v460_v2 = vpop.f32.mrf.mxu1 }
 0x4d4   :  { %v461_v5 = vadd.f32 %v551_v3, %v460_v2 }
 0x4db   :  { %v463_v4 = vpop.f32.mrf.mxu1 }
 0x4dc   :  { %v464_v6 = vadd.f32 %v551_v3, %v463_v4 }
 0x4de   :  { %v509_v7 = vpack.c.bf16 %v464_v6, %v461_v5 }
 0x4e0   :  { %510 = vst [vmem:[#allocation7] sm:$0xff] %v509_v7  }
 0x4e1   :  { %482 = dma.vmem_to_hbm [thread:$0]  %s475_s25, 128, %s477_s28, [#allocation4], %s657_s17, %s657_s17, %s658_s18  }
 0x4e2   :  { %654 = dma.done.wait [#allocation4], 128  }
 0x4e3   :  { %655 = vsyncadd [#allocation4], 4294967168 }
 0x4e4   :  { %487 = vsyncpa [#allocation3], 1 }
 0x4e5   :  { %488 = vsyncpa [#allocation6], 1 }
 0x4e6   :  { %489 = vsyncpa [#allocation4], 1 }

</bundles_post_ra>
